<compile_context>
chip_gen: v7x
topology: tpu7x:2x2x1
jax: 0.10.0
libtpu: 0.0.40
codegen_flags: <defaults>
</compile_context>

<pallas_src>
import math
import numpy as np
import jax
import jax.numpy as jnp
from jax.experimental import pallas as pl
from jax.experimental.pallas import tpu as pltpu


def make_dct_matrix(n_dct: int) -> np.ndarray:
    """Deterministically build V_qf = scipy.fft.dct(eye(n), type=2, norm='ortho').T
    without scipy: V_qf[q, f] = s_q * cos(pi * (2f + 1) * q / (2n))."""
    q = np.arange(n_dct, dtype=np.float64)[:, None]
    f = np.arange(n_dct, dtype=np.float64)[None, :]
    V_qf = np.cos(np.pi * (2.0 * f + 1.0) * q / (2.0 * n_dct))
    scale = np.full((n_dct, 1), math.sqrt(2.0 / n_dct), dtype=np.float64)
    scale[0, 0] = math.sqrt(1.0 / n_dct)
    return (V_qf * scale).astype(np.float32)


def _dct_kernel(x_ref, w_ref, o_ref):
    # x_ref: (TM, K), w_ref: (K, K) block-diag kron(I_pack, V_qf.T), o_ref: (TM, K)
    o_ref[...] = jnp.dot(
        x_ref[...], w_ref[...], preferred_element_type=jnp.float32
    ).astype(o_ref.dtype)


def linear_dct(x: jax.Array, V_qf: jax.Array, *, tm: int = 1024) -> jax.Array:
    """Pallas equivalent of LinearDCT.forward: F.linear(x, V_qf).

    tm = rows per grid step in *packed* (lane-dense) space.  Tunable knob:
    512-2048 keeps this HBM-bound kernel near roofline on v5e/v6e/v7x while
    staying well inside the default scoped-VMEM limit.
    """
    n_dct = V_qf.shape[0]
    assert x.shape[-1] == n_dct, "last dim must equal n_dct"

    lead_shape = x.shape[:-1]
    M = int(np.prod(lead_shape)) if lead_shape else 1
    x2 = x.reshape(M, n_dct)

    # --- lane packing: fold `pack` DCTs per row so the last dim is 128 ------
    if n_dct <= 128 and 128 % n_dct == 0:
        pack = 128 // n_dct
    else:
        pack = 1  # fall back to the plain layout for awkward n_dct
    K = pack * n_dct

    Mp = -(-M // pack)  # ceil(M / pack): packed row count
    if Mp * pack != M:
        # Rare: tiny tail pad so the packing reshape is valid.
        x2 = jnp.pad(x2, ((0, Mp * pack - M), (0, 0)))
    # (M, n_dct) -> (Mp, K) is a contiguous row-major reinterpretation: free.
    xp = x2.reshape(Mp, K)

    # Block-diagonal weight so that xp @ W computes V_qf.T per 32-wide segment.
    w = jnp.kron(jnp.eye(pack, dtype=V_qf.dtype), V_qf.T).astype(x.dtype)

    # --- row tile: multiple of 8 sublanes, not larger than needed -----------
    tm_eff = min(int(tm), ((Mp + 7) // 8) * 8)
    tm_eff = max(8, (tm_eff // 8) * 8)
    grid_m = -(-Mp // tm_eff)  # ragged last tile handled by Pallas masking

    out = pl.pallas_call(
        _dct_kernel,
        out_shape=jax.ShapeDtypeStruct((Mp, K), x.dtype),
        grid_spec=pltpu.PrefetchScalarGridSpec(
            num_scalar_prefetch=0,
            grid=(grid_m,),
            in_specs=[
                pl.BlockSpec((tm_eff, K), lambda i: (i, 0)),
                pl.BlockSpec((K, K), lambda i: (0, 0)),  # weight stays resident
            ],
            out_specs=pl.BlockSpec((tm_eff, K), lambda i: (i, 0)),
        ),
        compiler_params=pltpu.CompilerParams(
            dimension_semantics=("parallel",),  # shards grid across TCs on v7x
        ),
    )(xp, w)

    # Unpack lanes back to (M, n_dct), drop any pad rows, restore leading dims.
    y = out.reshape(Mp * pack, n_dct)[:M]
    return y.reshape(*lead_shape, n_dct)


if __name__ == "__main__":
    n_dct = 32
    V_qf = jnp.asarray(make_dct_matrix(n_dct))  # deterministic buffer (no .pt load)

    key = jax.random.PRNGKey(0)
    x = jax.random.normal(key, (2, 4, 8, n_dct), dtype=jnp.float32)

    y = linear_dct(x, V_qf)
    y = jax.block_until_ready(y)

    # Reference check against plain-JAX F.linear semantics: x @ V_qf.T
    y_ref = jnp.einsum("...f,qf->...q", x, V_qf)
    assert y.shape == x.shape
    np.testing.assert_allclose(np.asarray(y), np.asarray(y_ref), rtol=1e-5, atol=1e-5)

    print("KERNEL_OK")
</pallas_src>

<mosaic_0001>
module attributes {stable_mosaic.version = 11 : i64} {
  func.func @_dct_kernel(%arg0: i32, %arg1: memref<16x128xf32, #tpu.memory_space<vmem>>, %arg2: memref<128x128xf32, #tpu.memory_space<vmem>>, %arg3: memref<16x128xf32, #tpu.memory_space<vmem>>) attributes {dimension_semantics = [#tpu.dimension_semantics<parallel>], iteration_bounds = array<i64: 1>, scalar_prefetch = 0 : i64, scratch_operands = 0 : i64, tpu.core_type = #tpu.core_type<tc>, window_params = [{transform_indices = @transform_0, window_bounds = array<i64: 16, 128>}, {pipeline_mode = #tpu.pipeline_mode<synchronous>, transform_indices = @transform_1, window_bounds = array<i64: 128, 128>}, {transform_indices = @transform_2, window_bounds = array<i64: 16, 128>}]} {
    %c0 = arith.constant 0 : index
    %c0_0 = arith.constant 0 : index
    %0 = vector.load %arg1[%c0, %c0_0] : memref<16x128xf32, #tpu.memory_space<vmem>>, vector<16x128xf32>
    %c0_1 = arith.constant 0 : index
    %c0_2 = arith.constant 0 : index
    %1 = vector.load %arg2[%c0_1, %c0_2] : memref<128x128xf32, #tpu.memory_space<vmem>>, vector<128x128xf32>
    %cst = arith.constant dense<0.000000e+00> : vector<16x128xf32>
    %2 = tpu.matmul %0, %1, %cst {dimension_numbers = #tpu.dot_dimension_numbers<[1], [0], [0], [1], [0, 0, 1, 1], [], []>} : vector<16x128xf32>, vector<128x128xf32>, vector<16x128xf32> -> vector<16x128xf32>
    %c0_3 = arith.constant 0 : index
    %c0_4 = arith.constant 0 : index
    %3 = vector.load %arg3[%c0_3, %c0_4] : memref<16x128xf32, #tpu.memory_space<vmem>>, vector<16x128xf32>
    tpu.vector_store %arg3[%c0_3, %c0_4], %2 {strides = array<i32>} : memref<16x128xf32, #tpu.memory_space<vmem>>, vector<16x128xf32>,
    return
  }
  func.func @transform_0(%arg0: i32) -> (i32, i32) {
    %c0_i32 = arith.constant 0 : i32
    %c0_i32_0 = arith.constant 0 : i32
    return %arg0, %c0_i32 : i32, i32
  }
  func.func @transform_1(%arg0: i32) -> (i32, i32) {
    %c0_i32 = arith.constant 0 : i32
    %c0_i32_0 = arith.constant 0 : i32
    %c0_i32_1 = arith.constant 0 : i32
    return %c0_i32, %c0_i32_0 : i32, i32
  }
  func.func @transform_2(%arg0: i32) -> (i32, i32) {
    %c0_i32 = arith.constant 0 : i32
    %c0_i32_0 = arith.constant 0 : i32
    return %arg0, %c0_i32 : i32, i32
  }
}

</mosaic_0001>

<bundles_post_ra>
// kernel: tpu_custom_call.1
= control target key start
LH: loop header
LB: loop body
LE: loop exit
PB: predicated region body
PF: predicated region fallthrough
CT: control target
= control target key end

     0   :  { %7 = vsyncpa [#allocation3], 0  ;;  %s380_s0 = inlined_call_operand.hbm [shape: f32[16,128], index: 0, kind: input, shape index: {}]   ;;  %s381_s1 = inlined_call_operand.hbm [shape: f32[128,128], index: 1, kind: input, shape index: {}]   ;;  %s382_s2 = inlined_call_operand.hbm [shape: f32[16,128], index: 2, kind: output, shape index: {}]  }
   0x1   :  { %8 = vsyncpa [#allocation6], 0 }
   0x2   :  { %9 = vsyncpa [#allocation4], 0  ;;  %s315_s9 = smov [#allocation2]   ;;  %s243_s13 = scalar_lea.hbm %s380_s0, 256 }
   0x3   :  { %s15_s10 = sshll.u32 %s315_s9, 4  ;;  %p244_p0 = scmp.ne.s32.totalorder %s380_s0, %s243_s13  ;;  %s16_s10 = int_to_ptr.vmem [resolvable:$true] %s15_s10 }
   0x4   :  { %p247_p1 = scmp.lt.u32.totalorder %s243_s13, %s380_s0 }
   0x6   :  { %p249_p2 = pnand %p247_p1, %p244_p0 }
   0x8   :  { %252 = shalt.err (!%p249_p2)
}
   0x9   :  { %s253_s18 = scalar_lea.vmem %s16_s10, 256  ;;  %p258_p4 = scmp.lt.s32.totalorder %s16_s10, %s16_s10 }
   0xa   :  { %p254_p3 = scmp.ne.s32.totalorder %s16_s10, %s253_s18  ;;  %p259_p5 = scmp.lt.s32.totalorder %s253_s18, %s253_s18 }
   0xc   :  { %p260_p6 = por %p259_p5, %p258_p4 }
   0xe   :  { %p261_p7 = pnand %p260_p6, %p254_p3 }
  0x10   :  { %264 = shalt.err (!%p261_p7)
}
  0x11   :  { %s316_s19 = smov 128   ;;  %s317_s20 = smov 8  }
  0x12   :  { %21 = dma.hbm_to_vmem [thread:$0]  %s380_s0, 256, %s16_s10, [#allocation3], %s316_s19, %s316_s19, %s317_s20  }
  0x13   :  { %s318_s23 = smov [#allocation5]   ;;  %s265_s27 = scalar_lea.hbm %s381_s1, 2048 }
  0x14   :  { %s27_s24 = sshll.u32 %s318_s23, 4  ;;  %p266_p8 = scmp.ne.s32.totalorder %s381_s1, %s265_s27  ;;  %s28_s24 = int_to_ptr.vmem [resolvable:$true] %s27_s24 }
  0x15   :  { %p269_p9 = scmp.lt.u32.totalorder %s265_s27, %s381_s1 }
  0x17   :  { %p271_p10 = pnand %p269_p9, %p266_p8 }
  0x19   :  { %274 = shalt.err (!%p271_p10)
}
  0x1a   :  { %s275_s4 = scalar_lea.vmem %s28_s24, 2048  ;;  %p280_p12 = scmp.lt.s32.totalorder %s28_s24, %s28_s24 }
  0x1b   :  { %p276_p11 = scmp.ne.s32.totalorder %s28_s24, %s275_s4  ;;  %p281_p13 = scmp.lt.s32.totalorder %s275_s4, %s275_s4 }
  0x1d   :  { %p282_p0 = por %p281_p13, %p280_p12 }
  0x1f   :  { %p283_p1 = pnand %p282_p0, %p276_p11 }
  0x21   :  { %286 = shalt.err (!%p283_p1)
}
  0x22   :  { %33 = dma.hbm_to_vmem [thread:$0]  %s381_s1, 2048, %s28_s24, [#allocation6], %s316_s19, %s316_s19, %s317_s20  }
  0x23   :  { %309 = dma.done.wait [#allocation3], 256  }
  0x24   :  { %310 = vsyncadd [#allocation3], 4294967040 }
  0x25   :  { %311 = dma.done.wait [#allocation6], 2048  }
  0x26   :  { %312 = vsyncadd [#allocation6], 4294965248  ;;  %v42_v0 = vld [vmem:[#allocation5] sm:$0xff]  ;;  %v43_v1 = vld [vmem:[#allocation5 + $0x8] sm:$0xff]  ;;  %s319_s1 = smov [#allocation7]  }
  0x27   :  { %v44_v2 = vld [vmem:[#allocation5 + $0x10] sm:$0xff]  ;;  %v206_v3 = vpack.c.bf16 %v43_v1, %v42_v0  ;;  %v45_v4 = vld [vmem:[#allocation5 + $0x18] sm:$0xff]  ;;  %v46_v6 = vld [vmem:[#allocation5 + $0x20] sm:$0xff]  ;;  %s140_s6 = sshll.u32 %s319_s1, 4  ;;  %s141_s6 = int_to_ptr.vmem [resolvable:$true] %s140_s6 }
  0x28   :  { %v210_v5 = vpack.c.bf16 %v45_v4, %v44_v2  ;;  %v47_v7 = vld [vmem:[#allocation5 + $0x28] sm:$0xff]  ;;  %v40_v9 = vld [vmem:[#allocation2] sm:$0xff]  ;;  %v49_v11 = vld [vmem:[#allocation5 + $0x38] sm:$0xff]  ;;  %s287_s7 = scalar_lea.vmem %s141_s6, 256  ;;  %p292_p3 = scmp.lt.s32.totalorder %s141_s6, %s141_s6 }
  0x29   :  { %207 = vmatprep.subr.bf16.mxu0 %v206_v3  ;;  %v214_v8 = vpack.c.bf16 %v47_v7, %v46_v6  ;;  %v48_v10 = vld [vmem:[#allocation5 + $0x30] sm:$0xff]  ;;  %203 = vmatprep.mubr.f32.mxu0 %v40_v9  ;;  %v50_v13 = vld [vmem:[#allocation5 + $0x40] sm:$0xff]  ;;  %v51_v14 = vld [vmem:[#allocation5 + $0x48] sm:$0xff]  ;;  %p288_p2 = scmp.ne.s32.totalorder %s141_s6, %s287_s7  ;;  %p293_p4 = scmp.lt.s32.totalorder %s287_s7, %s287_s7 }
  0x2a   :  { %209 = vmatpush3.bf16.msra.mxu0 %v206_v3  ;;  %v218_v12 = vpack.c.bf16 %v49_v11, %v48_v10  ;;  %v222_v15 = vpack.c.bf16 %v51_v14, %v50_v13  ;;  %v52_v16 = vld [vmem:[#allocation5 + $0x50] sm:$0xff]  ;;  %v53_v17 = vld [vmem:[#allocation5 + $0x58] sm:$0xff]  ;;  %v54_v19 = vld [vmem:[#allocation5 + $0x60] sm:$0xff] }
  0x2b   :  { %211 = vmatprep.subr.bf16.mxu0 %v210_v5  ;;  %v226_v18 = vpack.c.bf16 %v53_v17, %v52_v16  ;;  %v55_v20 = vld [vmem:[#allocation5 + $0x68] sm:$0xff]  ;;  %v56_v22 = vld [vmem:[#allocation5 + $0x70] sm:$0xff]  ;;  %v57_v23 = vld [vmem:[#allocation5 + $0x78] sm:$0xff]  ;;  %p294_p5 = por %p293_p4, %p292_p3 }
  0x2c   :  { %v230_v21 = vpack.c.bf16 %v55_v20, %v54_v19  ;;  %v234_v24 = vpack.c.bf16 %v57_v23, %v56_v22  ;;  %v41_v25 = vld [vmem:[#allocation2 + $0x8] sm:$0xff] }
  0x2d   :  { %p295_p6 = pnand %p294_p5, %p288_p2 }
  0x2e   :  { %213 = vmatpush3.bf16.msra.mxu0 %v210_v5 }
  0x2f   :  { %215 = vmatprep.subr.bf16.mxu0 %v214_v8 }
  0x32   :  { %217 = vmatpush3.bf16.msra.mxu0 %v214_v8 }
  0x33   :  { %219 = vmatprep.subr.bf16.mxu0 %v218_v12 }
  0x36   :  { %221 = vmatpush3.bf16.msra.mxu0 %v218_v12 }
  0x37   :  { %223 = vmatprep.subr.bf16.mxu0 %v222_v15 }
  0x3a   :  { %225 = vmatpush3.bf16.msra.mxu0 %v222_v15 }
  0x3b   :  { %227 = vmatprep.subr.bf16.mxu0 %v226_v18 }
  0x3e   :  { %229 = vmatpush3.bf16.msra.mxu0 %v226_v18 }
  0x3f   :  { %231 = vmatprep.subr.bf16.mxu0 %v230_v21 }
  0x42   :  { %233 = vmatpush3.bf16.msra.mxu0 %v230_v21 }
  0x43   :  { %235 = vmatprep.subr.bf16.mxu0 %v234_v24 }
  0x46   :  { %237 = vmatpush3.bf16.msra.mxu0 %v234_v24 }
  0x49   :  { %204 = vmatmul.mubr.f32.vlgmr.msra.gmra.mrb[0].mxu0 %v41_v25 }
 0x11c   :  { %v205_v26 = vpop.f32.mrb[0].mxu0 }
 0x11d   :  { %134 = vst [vmem:[#allocation7 + $0x8] sm:$0xff] %v205_v26  ;;  %v124_v27 = vpop.f32.mrb[1].mxu0 }
 0x11e   :  { %133 = vst [vmem:[#allocation7] sm:$0xff] %v124_v27 }
 0x11f   :  { %298 = shalt.err (!%p295_p6)
}
 0x120   :  { %s299_s10 = scalar_lea.hbm %s382_s2, 256 }
 0x121   :  { %p300_p7 = scmp.ne.s32.totalorder %s382_s2, %s299_s10  ;;  %p303_p8 = scmp.lt.u32.totalorder %s299_s10, %s382_s2 }
 0x123   :  { %p305_p9 = pnand %p303_p8, %p300_p7 }
 0x125   :  { %308 = shalt.err (!%p305_p9)
}
 0x126   :  { %146 = dma.vmem_to_hbm [thread:$0]  %s141_s6, 256, %s382_s2, [#allocation4], %s316_s19, %s316_s19, %s317_s20  }
 0x127   :  { %313 = dma.done.wait [#allocation4], 256  }
 0x128   :  { %314 = vsyncadd [#allocation4], 4294967040 }
 0x129   :  { %150 = vsyncpa [#allocation3], 1 }
 0x12a   :  { %151 = vsyncpa [#allocation6], 1 }
 0x12b   :  { %152 = vsyncpa [#allocation4], 1 }

</bundles_post_ra>
